<compile_context>
chip_gen: v7x
topology: tpu7x:2x2x1
jax: 0.10.0
libtpu: 0.0.40
codegen_flags: <defaults>
</compile_context>

<pallas_src>
import functools

import numpy as np
import jax
import jax.numpy as jnp
from jax import lax
from jax.experimental import pallas as pl
from jax.experimental.pallas import tpu as pltpu

EPS = 1e-6
_LANE = 128


def _vmem_spec():
    # Whole (small) array resident in VMEM, no blocking / grid.
    return pl.BlockSpec(memory_space=pltpu.MemorySpace.VMEM)


def _round_up(n, m=_LANE):
    return ((n + m - 1) // m) * m


def _pad_axis(x, target, axis):
    pad = target - x.shape[axis]
    if pad <= 0:
        return x
    widths = [(0, 0)] * x.ndim
    widths[axis] = (0, pad)
    return jnp.pad(x, widths)


# ---------------------------------------------------------------------------
# Fused kernel: Aw(W), Ah(H) MLP gates + β-divergence multiplicative updates.
# ---------------------------------------------------------------------------
def _gate(x_ref, w0, b0, w1, b1, w2, b2, L, R):
    """3-layer ReLU MLP on a flat (1, S) bf16 input; bf16 weights, f32 accumulate.
    Flat output -> (rows, cols) via exact 0/1 selection matmuls (no reshape)."""
    x = x_ref[...]                                                      # bf16
    y0 = jnp.maximum(jnp.dot(x, w0[...], preferred_element_type=jnp.float32) + b0[...], 0.0)
    y1 = jnp.maximum(jnp.dot(y0.astype(jnp.bfloat16), w1[...],
                             preferred_element_type=jnp.float32) + b1[...], 0.0)
    y2 = jnp.maximum(jnp.dot(y1.astype(jnp.bfloat16), w2[...],
                             preferred_element_type=jnp.float32) + b2[...], 0.0)
    # out[i,j] == y2[0, i*cols + j]  (exact: one nonzero per output element)
    return jnp.dot(L[...] * y2, R[...], preferred_element_type=jnp.float32)


def ralmu_kernel(v_ref, w_ref, h_ref, wf_ref, hf_ref,
                 aw_w0, aw_b0, aw_w1, aw_b1, aw_w2, aw_b2, aw_L, aw_R,
                 ah_w0, ah_b0, ah_w1, ah_b1, ah_w2, ah_b2, ah_L, ah_R,
                 w_out, h_out, *, beta, eps):
    V = v_ref[...]
    W = w_ref[...]
    H = h_ref[...]
    f, t = V.shape

    # MLP gates computed inline (fused, bf16 matmuls / f32 accumulate).
    aw = _gate(wf_ref, aw_w0, aw_b0, aw_w1, aw_b1, aw_w2, aw_b2, aw_L, aw_R)   # (f, l)
    ah = _gate(hf_ref, ah_w0, ah_b0, ah_w1, ah_b1, ah_w2, ah_b2, ah_L, ah_R)   # (l, t)

    # A (m,k) x B (n,k) -> A @ B.T : (m, n)   (no explicit transpose)
    dn_last = (((1,), (1,)), ((), ()))
    # A (k,m) x B (k,n) -> A.T @ B : (m, n)
    dn_first = (((0,), (0,)), ((), ()))

    def pow_terms(wh):
        # beta is a static Python float -> specialized at trace time.
        if beta == 2.0:
            return V, wh                               # wh**0 * V, wh**1
        p = jnp.exp((beta - 2.0) * jnp.log(wh))        # wh ** (beta - 2)
        return p * V, p * wh                           # wh**(beta-2)*V, wh**(beta-1)

    # ----------------------------- W update -----------------------------
    wh = jnp.dot(W, H, preferred_element_type=jnp.float32) + eps
    if beta == 1.0:
        s = V * pl.reciprocal(wh, approx=True)                      # wh**(-1) * V
        # den_W[i,j] = sum_t H[j,t] + eps  -> XLU lane-reduce; fold its
        # reciprocal into H's rows so the update is ONE matmul.
        r_h = pl.reciprocal(jnp.sum(H, axis=-1, keepdims=True) + eps, approx=True)  # (l,1)
        upd_W = lax.dot_general(s, H * r_h, dn_last,
                                preferred_element_type=jnp.float32)
    else:
        s, wh1 = pow_terms(wh)
        stacked = jnp.concatenate([s, wh1], axis=0)                  # (2f, t)
        res = lax.dot_general(stacked, H, dn_last,
                              preferred_element_type=jnp.float32)    # (2f, l)
        num_W = res[:f]
        den_W = res[f:] + eps
        upd_W = num_W * pl.reciprocal(den_W, approx=True)
    W_new = jnp.maximum(W * aw * upd_W, eps)                         # clamp(min=eps)
    w_out[...] = W_new

    # ----------------------- H update (uses W_new) -----------------------
    wh2 = jnp.dot(W_new, H, preferred_element_type=jnp.float32) + eps
    if beta == 1.0:
        s2 = V * pl.reciprocal(wh2, approx=True)
        # den_H[i,j] = sum_f W_new[f,i] + eps -> sublane reduce; fold its
        # reciprocal into W_new's columns -> ONE matmul for the H update.
        c_w = pl.reciprocal(jnp.sum(W_new, axis=0, keepdims=True) + eps, approx=True)  # (1,l)
        upd_H = lax.dot_general(W_new * c_w, s2, dn_first,
                                preferred_element_type=jnp.float32)
    else:
        s2, wh2_1 = pow_terms(wh2)
        stacked2 = jnp.concatenate([s2, wh2_1], axis=1)              # (f, 2t)
        res2 = lax.dot_general(W_new, stacked2, dn_first,
                               preferred_element_type=jnp.float32)   # (l, 2t)
        num_H = res2[:, :t]
        den_H = res2[:, t:] + eps
        upd_H = num_H * pl.reciprocal(den_H, approx=True)
    H_new = jnp.maximum(H * ah * upd_H, eps)                         # clamp(min=eps)
    h_out[...] = H_new


# ---------------------------------------------------------------------------
# Wrapper / parameter preparation
# ---------------------------------------------------------------------------
def prepare_gate_params(raw_params, rows, cols):
    """raw_params = (w0t (S,130), b0 (1,130), w1t (130,75), b1 (1,75),
                     w2t (75,S),  b2 (1,S)) with S = rows*cols.
    Zero-pads every dim to a multiple of 128 (exact: padded weights/biases are 0,
    ReLU(0)=0), stores weights as bf16 (MXU-native, halves DMA), biases f32, and
    builds the flat->(rows,cols) selection matrices L, R."""
    w0t, b0, w1t, b1, w2t, b2 = raw_params
    S = rows * cols
    assert w0t.shape[0] == S
    Sp = _round_up(S)
    h0p = _round_up(w0t.shape[1])
    h1p = _round_up(w1t.shape[1])

    w0p = _pad_axis(_pad_axis(w0t, Sp, 0), h0p, 1).astype(jnp.bfloat16)
    b0p = _pad_axis(b0, h0p, 1)
    w1p = _pad_axis(_pad_axis(w1t, h0p, 0), h1p, 1).astype(jnp.bfloat16)
    b1p = _pad_axis(b1, h1p, 1)
    w2p = _pad_axis(_pad_axis(w2t, h1p, 0), Sp, 1).astype(jnp.bfloat16)
    b2p = _pad_axis(b2, Sp, 1)

    k = np.arange(S)
    L = np.zeros((rows, Sp), np.float32)
    L[k // cols, k] = 1.0
    R = np.zeros((Sp, cols), np.float32)
    R[k, k % cols] = 1.0
    return (w0p, b0p, w1p, b1p, w2p, b2p, jnp.asarray(L), jnp.asarray(R))


def ralmu_block2(V, W, H, aw_params, ah_params, *, beta=1.0, eps=EPS):
    """aw_params / ah_params are outputs of prepare_gate_params."""
    f, l = W.shape
    l2, t = H.shape
    assert l2 == l
    sw_pad = aw_params[0].shape[0]
    sh_pad = ah_params[0].shape[0]
    # Flat gate inputs built in the wrapper (bf16 to halve DMA + match MXU input).
    Wf = _pad_axis(W.reshape(1, f * l), sw_pad, 1).astype(jnp.bfloat16)
    Hf = _pad_axis(H.reshape(1, l * t), sh_pad, 1).astype(jnp.bfloat16)

    inputs = (V, W, H, Wf, Hf) + tuple(aw_params) + tuple(ah_params)
    kernel = functools.partial(ralmu_kernel, beta=float(beta), eps=float(eps))
    return pl.pallas_call(
        kernel,
        out_shape=(jax.ShapeDtypeStruct((f, l), jnp.float32),
                   jax.ShapeDtypeStruct((l, t), jnp.float32)),
        in_specs=[_vmem_spec()] * len(inputs),
        out_specs=(_vmem_spec(), _vmem_spec()),
    )(*inputs)


# ---------------------------------------------------------------------------
# Pure-JAX reference (same math; gate MLP mirrors the kernel's bf16 matmuls).
# ---------------------------------------------------------------------------
def ralmu_ref(V, W, H, aw_params, ah_params, *, beta=1.0, eps=EPS):
    def mlp(x, p):
        w0t, b0, w1t, b1, w2t, b2 = p
        shape = x.shape
        xf = x.reshape(1, -1).astype(jnp.bfloat16)
        y0 = jnp.maximum(jnp.dot(xf, w0t.astype(jnp.bfloat16),
                                 preferred_element_type=jnp.float32) + b0, 0.0)
        y1 = jnp.maximum(jnp.dot(y0.astype(jnp.bfloat16), w1t.astype(jnp.bfloat16),
                                 preferred_element_type=jnp.float32) + b1, 0.0)
        y2 = jnp.maximum(jnp.dot(y1.astype(jnp.bfloat16), w2t.astype(jnp.bfloat16),
                                 preferred_element_type=jnp.float32) + b2, 0.0)
        return y2.reshape(shape)

    wh = W @ H + eps
    wh_2_v = wh ** (beta - 2.0) * V
    wh_1 = wh ** (beta - 1.0)
    update_W = (wh_2_v @ H.T) / (wh_1 @ H.T + eps)
    W_new = jnp.maximum(W * mlp(W, aw_params) * update_W, eps)

    wh = W_new @ H + eps
    wh_2_v = wh ** (beta - 2.0) * V
    wh_1 = wh ** (beta - 1.0)
    update_H = (W_new.T @ wh_2_v) / (W_new.T @ wh_1 + eps)
    H_new = jnp.maximum(H * mlp(H, ah_params) * update_H, eps)
    return W_new, H_new


def init_mlp_params(key, size):
    """PyTorch nn.Linear default init: U(-1/sqrt(fan_in), +1/sqrt(fan_in)).
    Weights pre-transposed to (in, out)."""
    dims = [(130, size), (75, 130), (size, 75)]
    params = []
    for (out_d, in_d) in dims:
        key, kw, kb = jax.random.split(key, 3)
        bound = 1.0 / np.sqrt(in_d)
        w = jax.random.uniform(kw, (out_d, in_d), jnp.float32, -bound, bound)
        b = jax.random.uniform(kb, (1, out_d), jnp.float32, -bound, bound)
        params.extend([w.T, b])
    return tuple(params)


if __name__ == "__main__":
    f, l, t = 16, 8, 16         # V:(16,16), W:(16,8), H:(8,16)
    beta = 1.0                  # module default (specialized path in the kernel)

    key = jax.random.PRNGKey(0)
    k_v, k_w, k_h, k_aw, k_ah = jax.random.split(key, 5)
    # Nonnegative inputs (standard for NMF-style multiplicative updates).
    V = jax.random.uniform(k_v, (f, t), jnp.float32, 0.1, 1.0)
    W = jax.random.uniform(k_w, (f, l), jnp.float32, 0.1, 1.0)
    H = jax.random.uniform(k_h, (l, t), jnp.float32, 0.1, 1.0)

    aw_raw = init_mlp_params(k_aw, f * l)   # Aw: w_size = f*l
    ah_raw = init_mlp_params(k_ah, l * t)   # Ah: h_size = l*t
    aw_prep = prepare_gate_params(aw_raw, f, l)
    ah_prep = prepare_gate_params(ah_raw, l, t)

    W_new, H_new = ralmu_block2(V, W, H, aw_prep, ah_prep, beta=beta)
    jax.block_until_ready((W_new, H_new))

    # Tolerance accounts for EUP approximate reciprocals (~1e-4 rel, chained)
    # and f32 accumulation-order differences; gate bf16 casts are mirrored in
    # the reference so they do not widen the gap.
    W_ref, H_ref = ralmu_ref(V, W, H, aw_raw, ah_raw, beta=beta)
    np.testing.assert_allclose(np.asarray(W_new), np.asarray(W_ref), rtol=5e-3, atol=1e-5)
    np.testing.assert_allclose(np.asarray(H_new), np.asarray(H_ref), rtol=5e-3, atol=1e-5)

    print("KERNEL_OK")
</pallas_src>

<mosaic_0001>
module attributes {stable_mosaic.version = 11 : i64} {
  func.func @ralmu_kernel(%arg0: memref<16x16xf32, #tpu.memory_space<vmem>>, %arg1: memref<16x8xf32, #tpu.memory_space<vmem>>, %arg2: memref<8x16xf32, #tpu.memory_space<vmem>>, %arg3: memref<1x128xbf16, #tpu.memory_space<vmem>>, %arg4: memref<1x128xbf16, #tpu.memory_space<vmem>>, %arg5: memref<128x256xbf16, #tpu.memory_space<vmem>>, %arg6: memref<1x256xf32, #tpu.memory_space<vmem>>, %arg7: memref<256x128xbf16, #tpu.memory_space<vmem>>, %arg8: memref<1x128xf32, #tpu.memory_space<vmem>>, %arg9: memref<128x128xbf16, #tpu.memory_space<vmem>>, %arg10: memref<1x128xf32, #tpu.memory_space<vmem>>, %arg11: memref<16x128xf32, #tpu.memory_space<vmem>>, %arg12: memref<128x8xf32, #tpu.memory_space<vmem>>, %arg13: memref<128x256xbf16, #tpu.memory_space<vmem>>, %arg14: memref<1x256xf32, #tpu.memory_space<vmem>>, %arg15: memref<256x128xbf16, #tpu.memory_space<vmem>>, %arg16: memref<1x128xf32, #tpu.memory_space<vmem>>, %arg17: memref<128x128xbf16, #tpu.memory_space<vmem>>, %arg18: memref<1x128xf32, #tpu.memory_space<vmem>>, %arg19: memref<8x128xf32, #tpu.memory_space<vmem>>, %arg20: memref<128x16xf32, #tpu.memory_space<vmem>>, %arg21: memref<16x8xf32, #tpu.memory_space<vmem>>, %arg22: memref<8x16xf32, #tpu.memory_space<vmem>>) attributes {dimension_semantics = [], scalar_prefetch = 0 : i64, scratch_operands = 0 : i64, tpu.core_type = #tpu.core_type<tc>} {
    %c0 = arith.constant 0 : index
    %c0_0 = arith.constant 0 : index
    %0 = vector.load %arg0[%c0, %c0_0] : memref<16x16xf32, #tpu.memory_space<vmem>>, vector<16x16xf32>
    %c0_1 = arith.constant 0 : index
    %c0_2 = arith.constant 0 : index
    %1 = vector.load %arg1[%c0_1, %c0_2] : memref<16x8xf32, #tpu.memory_space<vmem>>, vector<16x8xf32>
    %c0_3 = arith.constant 0 : index
    %c0_4 = arith.constant 0 : index
    %2 = vector.load %arg2[%c0_3, %c0_4] : memref<8x16xf32, #tpu.memory_space<vmem>>, vector<8x16xf32>
    %c0_5 = arith.constant 0 : index
    %c0_6 = arith.constant 0 : index
    %3 = vector.load %arg3[%c0_5, %c0_6] : memref<1x128xbf16, #tpu.memory_space<vmem>>, vector<1x128xbf16>
    %c0_7 = arith.constant 0 : index
    %c0_8 = arith.constant 0 : index
    %4 = vector.load %arg5[%c0_7, %c0_8] : memref<128x256xbf16, #tpu.memory_space<vmem>>, vector<128x256xbf16>
    %cst = arith.constant dense<0.000000e+00> : vector<1x256xf32>
    %5 = tpu.matmul %3, %4, %cst {dimension_numbers = #tpu.dot_dimension_numbers<[1], [0], [0], [1], [0, 0, 1, 1], [], []>} : vector<1x128xbf16>, vector<128x256xbf16>, vector<1x256xf32> -> vector<1x256xf32>
    %c0_9 = arith.constant 0 : index
    %c0_10 = arith.constant 0 : index
    %6 = vector.load %arg6[%c0_9, %c0_10] : memref<1x256xf32, #tpu.memory_space<vmem>>, vector<1x256xf32>
    %7 = arith.addf %5, %6 : vector<1x256xf32>
    %cst_11 = arith.constant 0.000000e+00 : f32
    %8 = vector.broadcast %cst_11 : f32 to vector<1x256xf32>
    %9 = arith.maximumf %7, %8 : vector<1x256xf32>
    %10 = arith.truncf %9 : vector<1x256xf32> to vector<1x256xbf16>
    %c0_12 = arith.constant 0 : index
    %c0_13 = arith.constant 0 : index
    %11 = vector.load %arg7[%c0_12, %c0_13] : memref<256x128xbf16, #tpu.memory_space<vmem>>, vector<256x128xbf16>
    %cst_14 = arith.constant dense<0.000000e+00> : vector<1x128xf32>
    %12 = tpu.matmul %10, %11, %cst_14 {dimension_numbers = #tpu.dot_dimension_numbers<[1], [0], [0], [1], [0, 0, 1, 1], [], []>} : vector<1x256xbf16>, vector<256x128xbf16>, vector<1x128xf32> -> vector<1x128xf32>
    %c0_15 = arith.constant 0 : index
    %c0_16 = arith.constant 0 : index
    %13 = vector.load %arg8[%c0_15, %c0_16] : memref<1x128xf32, #tpu.memory_space<vmem>>, vector<1x128xf32>
    %14 = arith.addf %12, %13 : vector<1x128xf32>
    %cst_17 = arith.constant 0.000000e+00 : f32
    %15 = vector.broadcast %cst_17 : f32 to vector<1x128xf32>
    %16 = arith.maximumf %14, %15 : vector<1x128xf32>
    %17 = arith.truncf %16 : vector<1x128xf32> to vector<1x128xbf16>
    %c0_18 = arith.constant 0 : index
    %c0_19 = arith.constant 0 : index
    %18 = vector.load %arg9[%c0_18, %c0_19] : memref<128x128xbf16, #tpu.memory_space<vmem>>, vector<128x128xbf16>
    %cst_20 = arith.constant dense<0.000000e+00> : vector<1x128xf32>
    %19 = tpu.matmul %17, %18, %cst_20 {dimension_numbers = #tpu.dot_dimension_numbers<[1], [0], [0], [1], [0, 0, 1, 1], [], []>} : vector<1x128xbf16>, vector<128x128xbf16>, vector<1x128xf32> -> vector<1x128xf32>
    %c0_21 = arith.constant 0 : index
    %c0_22 = arith.constant 0 : index
    %20 = vector.load %arg10[%c0_21, %c0_22] : memref<1x128xf32, #tpu.memory_space<vmem>>, vector<1x128xf32>
    %21 = arith.addf %19, %20 : vector<1x128xf32>
    %cst_23 = arith.constant 0.000000e+00 : f32
    %22 = vector.broadcast %cst_23 : f32 to vector<1x128xf32>
    %23 = arith.maximumf %21, %22 : vector<1x128xf32>
    %c0_24 = arith.constant 0 : index
    %c0_25 = arith.constant 0 : index
    %24 = vector.load %arg11[%c0_24, %c0_25] : memref<16x128xf32, #tpu.memory_space<vmem>>, vector<16x128xf32>
    %25 = vector.broadcast %23 : vector<1x128xf32> to vector<16x128xf32>
    %26 = arith.mulf %24, %25 : vector<16x128xf32>
    %c0_26 = arith.constant 0 : index
    %c0_27 = arith.constant 0 : index
    %27 = vector.load %arg12[%c0_26, %c0_27] : memref<128x8xf32, #tpu.memory_space<vmem>>, vector<128x8xf32>
    %cst_28 = arith.constant dense<0.000000e+00> : vector<16x8xf32>
    %28 = tpu.matmul %26, %27, %cst_28 {dimension_numbers = #tpu.dot_dimension_numbers<[1], [0], [0], [1], [0, 0, 1, 1], [], []>} : vector<16x128xf32>, vector<128x8xf32>, vector<16x8xf32> -> vector<16x8xf32>
    %c0_29 = arith.constant 0 : index
    %c0_30 = arith.constant 0 : index
    %29 = vector.load %arg4[%c0_29, %c0_30] : memref<1x128xbf16, #tpu.memory_space<vmem>>, vector<1x128xbf16>
    %c0_31 = arith.constant 0 : index
    %c0_32 = arith.constant 0 : index
    %30 = vector.load %arg13[%c0_31, %c0_32] : memref<128x256xbf16, #tpu.memory_space<vmem>>, vector<128x256xbf16>
    %cst_33 = arith.constant dense<0.000000e+00> : vector<1x256xf32>
    %31 = tpu.matmul %29, %30, %cst_33 {dimension_numbers = #tpu.dot_dimension_numbers<[1], [0], [0], [1], [0, 0, 1, 1], [], []>} : vector<1x128xbf16>, vector<128x256xbf16>, vector<1x256xf32> -> vector<1x256xf32>
    %c0_34 = arith.constant 0 : index
    %c0_35 = arith.constant 0 : index
    %32 = vector.load %arg14[%c0_34, %c0_35] : memref<1x256xf32, #tpu.memory_space<vmem>>, vector<1x256xf32>
    %33 = arith.addf %31, %32 : vector<1x256xf32>
    %cst_36 = arith.constant 0.000000e+00 : f32
    %34 = vector.broadcast %cst_36 : f32 to vector<1x256xf32>
    %35 = arith.maximumf %33, %34 : vector<1x256xf32>
    %36 = arith.truncf %35 : vector<1x256xf32> to vector<1x256xbf16>
    %c0_37 = arith.constant 0 : index
    %c0_38 = arith.constant 0 : index
    %37 = vector.load %arg15[%c0_37, %c0_38] : memref<256x128xbf16, #tpu.memory_space<vmem>>, vector<256x128xbf16>
    %cst_39 = arith.constant dense<0.000000e+00> : vector<1x128xf32>
    %38 = tpu.matmul %36, %37, %cst_39 {dimension_numbers = #tpu.dot_dimension_numbers<[1], [0], [0], [1], [0, 0, 1, 1], [], []>} : vector<1x256xbf16>, vector<256x128xbf16>, vector<1x128xf32> -> vector<1x128xf32>
    %c0_40 = arith.constant 0 : index
    %c0_41 = arith.constant 0 : index
    %39 = vector.load %arg16[%c0_40, %c0_41] : memref<1x128xf32, #tpu.memory_space<vmem>>, vector<1x128xf32>
    %40 = arith.addf %38, %39 : vector<1x128xf32>
    %cst_42 = arith.constant 0.000000e+00 : f32
    %41 = vector.broadcast %cst_42 : f32 to vector<1x128xf32>
    %42 = arith.maximumf %40, %41 : vector<1x128xf32>
    %43 = arith.truncf %42 : vector<1x128xf32> to vector<1x128xbf16>
    %c0_43 = arith.constant 0 : index
    %c0_44 = arith.constant 0 : index
    %44 = vector.load %arg17[%c0_43, %c0_44] : memref<128x128xbf16, #tpu.memory_space<vmem>>, vector<128x128xbf16>
    %cst_45 = arith.constant dense<0.000000e+00> : vector<1x128xf32>
    %45 = tpu.matmul %43, %44, %cst_45 {dimension_numbers = #tpu.dot_dimension_numbers<[1], [0], [0], [1], [0, 0, 1, 1], [], []>} : vector<1x128xbf16>, vector<128x128xbf16>, vector<1x128xf32> -> vector<1x128xf32>
    %c0_46 = arith.constant 0 : index
    %c0_47 = arith.constant 0 : index
    %46 = vector.load %arg18[%c0_46, %c0_47] : memref<1x128xf32, #tpu.memory_space<vmem>>, vector<1x128xf32>
    %47 = arith.addf %45, %46 : vector<1x128xf32>
    %cst_48 = arith.constant 0.000000e+00 : f32
    %48 = vector.broadcast %cst_48 : f32 to vector<1x128xf32>
    %49 = arith.maximumf %47, %48 : vector<1x128xf32>
    %c0_49 = arith.constant 0 : index
    %c0_50 = arith.constant 0 : index
    %50 = vector.load %arg19[%c0_49, %c0_50] : memref<8x128xf32, #tpu.memory_space<vmem>>, vector<8x128xf32>
    %51 = vector.broadcast %49 : vector<1x128xf32> to vector<8x128xf32>
    %52 = arith.mulf %50, %51 : vector<8x128xf32>
    %c0_51 = arith.constant 0 : index
    %c0_52 = arith.constant 0 : index
    %53 = vector.load %arg20[%c0_51, %c0_52] : memref<128x16xf32, #tpu.memory_space<vmem>>, vector<128x16xf32>
    %cst_53 = arith.constant dense<0.000000e+00> : vector<8x16xf32>
    %54 = tpu.matmul %52, %53, %cst_53 {dimension_numbers = #tpu.dot_dimension_numbers<[1], [0], [0], [1], [0, 0, 1, 1], [], []>} : vector<8x128xf32>, vector<128x16xf32>, vector<8x16xf32> -> vector<8x16xf32>
    %cst_54 = arith.constant dense<0.000000e+00> : vector<16x16xf32>
    %55 = tpu.matmul %1, %2, %cst_54 {dimension_numbers = #tpu.dot_dimension_numbers<[1], [0], [0], [1], [0, 0, 1, 1], [], []>} : vector<16x8xf32>, vector<8x16xf32>, vector<16x16xf32> -> vector<16x16xf32>
    %cst_55 = arith.constant 9.99999997E-7 : f32
    %56 = vector.broadcast %cst_55 : f32 to vector<16x16xf32>
    %57 = arith.addf %55, %56 : vector<16x16xf32>
    %58 = tpu.reciprocal %57 {approx = true} : vector<16x16xf32> -> vector<16x16xf32>
    %59 = arith.mulf %0, %58 : vector<16x16xf32>
    %cst_56 = arith.constant dense<0.000000e+00> : vector<8xf32>
    %60 = vector.multi_reduction <add>, %2, %cst_56 [1] : vector<8x16xf32> to vector<8xf32>
    %61 = vector.shape_cast %60 : vector<8xf32> to vector<8x1xf32>
    %cst_57 = arith.constant 9.99999997E-7 : f32
    %62 = vector.broadcast %cst_57 : f32 to vector<8x1xf32>
    %63 = arith.addf %61, %62 : vector<8x1xf32>
    %64 = tpu.reciprocal %63 {approx = true} : vector<8x1xf32> -> vector<8x1xf32>
    %65 = vector.broadcast %64 : vector<8x1xf32> to vector<8x16xf32>
    %66 = arith.mulf %2, %65 : vector<8x16xf32>
    %cst_58 = arith.constant dense<0.000000e+00> : vector<16x8xf32>
    %67 = tpu.matmul %59, %66, %cst_58 {dimension_numbers = #tpu.dot_dimension_numbers<[1], [1], [0], [0], [0, 0, 1, 0], [], []>} : vector<16x16xf32>, vector<8x16xf32>, vector<16x8xf32> -> vector<16x8xf32>
    %68 = arith.mulf %1, %28 : vector<16x8xf32>
    %69 = arith.mulf %68, %67 : vector<16x8xf32>
    %cst_59 = arith.constant 9.99999997E-7 : f32
    %70 = vector.broadcast %cst_59 : f32 to vector<16x8xf32>
    %71 = arith.maximumf %69, %70 : vector<16x8xf32>
    %c0_60 = arith.constant 0 : index
    %c0_61 = arith.constant 0 : index
    %72 = vector.load %arg21[%c0_60, %c0_61] : memref<16x8xf32, #tpu.memory_space<vmem>>, vector<16x8xf32>
    tpu.vector_store %arg21[%c0_60, %c0_61], %71 {strides = array<i32>} : memref<16x8xf32, #tpu.memory_space<vmem>>, vector<16x8xf32>,
    %cst_62 = arith.constant dense<0.000000e+00> : vector<16x16xf32>
    %73 = tpu.matmul %71, %2, %cst_62 {dimension_numbers = #tpu.dot_dimension_numbers<[1], [0], [0], [1], [0, 0, 1, 1], [], []>} : vector<16x8xf32>, vector<8x16xf32>, vector<16x16xf32> -> vector<16x16xf32>
    %cst_63 = arith.constant 9.99999997E-7 : f32
    %74 = vector.broadcast %cst_63 : f32 to vector<16x16xf32>
    %75 = arith.addf %73, %74 : vector<16x16xf32>
    %76 = tpu.reciprocal %75 {approx = true} : vector<16x16xf32> -> vector<16x16xf32>
    %77 = arith.mulf %0, %76 : vector<16x16xf32>
    %cst_64 = arith.constant dense<0.000000e+00> : vector<8xf32>
    %78 = vector.multi_reduction <add>, %71, %cst_64 [0] : vector<16x8xf32> to vector<8xf32>
    %79 = vector.shape_cast %78 : vector<8xf32> to vector<1x8xf32>
    %cst_65 = arith.constant 9.99999997E-7 : f32
    %80 = vector.broadcast %cst_65 : f32 to vector<1x8xf32>
    %81 = arith.addf %79, %80 : vector<1x8xf32>
    %82 = tpu.reciprocal %81 {approx = true} : vector<1x8xf32> -> vector<1x8xf32>
    %83 = vector.broadcast %82 : vector<1x8xf32> to vector<16x8xf32>
    %84 = arith.mulf %71, %83 : vector<16x8xf32>
    %cst_66 = arith.constant dense<0.000000e+00> : vector<8x16xf32>
    %85 = tpu.matmul %84, %77, %cst_66 {dimension_numbers = #tpu.dot_dimension_numbers<[0], [0], [1], [1], [0, 1, 1, 1], [], []>} : vector<16x8xf32>, vector<16x16xf32>, vector<8x16xf32> -> vector<8x16xf32>
    %86 = arith.mulf %2, %54 : vector<8x16xf32>
    %87 = arith.mulf %86, %85 : vector<8x16xf32>
    %cst_67 = arith.constant 9.99999997E-7 : f32
    %88 = vector.broadcast %cst_67 : f32 to vector<8x16xf32>
    %89 = arith.maximumf %87, %88 : vector<8x16xf32>
    %c0_68 = arith.constant 0 : index
    %c0_69 = arith.constant 0 : index
    %90 = vector.load %arg22[%c0_68, %c0_69] : memref<8x16xf32, #tpu.memory_space<vmem>>, vector<8x16xf32>
    tpu.vector_store %arg22[%c0_68, %c0_69], %89 {strides = array<i32>} : memref<8x16xf32, #tpu.memory_space<vmem>>, vector<8x16xf32>,
    return
  }
}

</mosaic_0001>

<bundles_post_ra>
// kernel: tpu_custom_call.1
= control target key start
LH: loop header
LB: loop body
LE: loop exit
PB: predicated region body
PF: predicated region fallthrough
CT: control target
= control target key end

     0   :  { %s3088_s0 = inlined_call_operand.hbm [shape: f32[16,16], index: 0, kind: input, shape index: {}]   ;;  %s3089_s1 = inlined_call_operand.vmem [shape: f32[16,8], index: 1, kind: input, shape index: {}]   ;;  %s3090_s2 = inlined_call_operand.hbm [shape: f32[8,16], index: 2, kind: input, shape index: {}]   ;;  %s3091_s3 = inlined_call_operand.hbm [shape: bf16[1,128], index: 3, kind: input, shape index: {}]   ;;  %s3092_s4 = inlined_call_operand.hbm [shape: bf16[1,128], index: 4, kind: input, shape index: {}]   ;;  %s3093_s5 = inlined_call_operand.vmem [shape: bf16[128,256], index: 5, kind: input, shape index: {}]   ;;  %s3094_s6 = inlined_call_operand.hbm [shape: f32[1,256], index: 6, kind: input, shape index: {}]   ;;  %s3095_s7 = inlined_call_operand.vmem [shape: bf16[256,128], index: 7, kind: input, shape index: {}]   ;;  %s3096_s8 = inlined_call_operand.hbm [shape: f32[1,128], index: 8, kind: input, shape index: {}]   ;;  %s3097_s9 = inlined_call_operand.vmem [shape: bf16[128,128], index: 9, kind: input, shape index: {}]   ;;  %s3098_s10 = inlined_call_operand.hbm [shape: f32[1,128], index: 10, kind: input, shape index: {}]   ;;  %s3099_s11 = inlined_call_operand.vmem [shape: f32[16,128], index: 11, kind: input, shape index: {}]   ;;  %s3100_s12 = inlined_call_operand.vmem [shape: f32[128,8], index: 12, kind: input, shape index: {}]   ;;  %s3101_s13 = inlined_call_operand.hbm [shape: bf16[128,256], index: 13, kind: input, shape index: {}]   ;;  %s3102_s14 = inlined_call_operand.hbm [shape: f32[1,256], index: 14, kind: input, shape index: {}]   ;;  %s3103_s15 = inlined_call_operand.hbm [shape: bf16[256,128], index: 15, kind: input, shape index: {}]   ;;  %s3104_s16 = inlined_call_operand.vmem [shape: f32[1,128], index: 16, kind: input, shape index: {}]   ;;  %s3105_s17 = inlined_call_operand.hbm [shape: bf16[128,128], index: 17, kind: input, shape index: {}]   ;;  %s3106_s18 = inlined_call_operand.vmem [shape: f32[1,128], index: 18, kind: input, shape index: {}]   ;;  %s3107_s19 = inlined_call_operand.vmem [shape: f32[8,128], index: 19, kind: input, shape index: {}]   ;;  %s3108_s20 = inlined_call_operand.vmem [shape: f32[128,16], index: 20, kind: input, shape index: {}]   ;;  %s3109_s21 = inlined_call_operand.vmem [shape: f32[16,8], index: 21, kind: output, shape index: {0}]   ;;  %s3110_s22 = inlined_call_operand.hbm [shape: f32[8,16], index: 22, kind: output, shape index: {1}]  }
   0x1   :  { %3121 = sst [smem:[#allocation28_spill]] %s3088_s0 }
   0x2   :  { %3122 = sst [smem:[#allocation29_spill]] %s3089_s1 }
   0x3   :  { %3123 = sst [smem:[#allocation30_spill]] %s3090_s2 }
   0x4   :  { %3124 = sst [smem:[#allocation31_spill]] %s3091_s3 }
   0x5   :  { %3125 = sst [smem:[#allocation32_spill]] %s3092_s4 }
   0x6   :  { %3126 = sst [smem:[#allocation33_spill]] %s3093_s5 }
   0x7   :  { %3127 = sst [smem:[#allocation34_spill]] %s3094_s6 }
   0x8   :  { %28 = vsyncpa [#allocation3], 0 }
   0x9   :  { %29 = vsyncpa [#allocation6], 0 }
   0xa   :  { %30 = vsyncpa [#allocation9], 0 }
   0xb   :  { %31 = vsyncpa [#allocation12], 0 }
   0xc   :  { %32 = vsyncpa [#allocation15], 0 }
   0xd   :  { %33 = vsyncpa [#allocation18], 0 }
   0xe   :  { %34 = vsyncpa [#allocation4], 0  ;;  %s2475_s3 = smov [#allocation5]   ;;  %s2476_s29 = smov [#allocation8]  }
   0xf   :  { %s55_s28 = sshll.u32 %s2475_s3, 4  ;;  %s75_s30 = sshll.u32 %s2476_s29, 4  ;;  %s56_s28 = int_to_ptr.vmem [resolvable:$true] %s55_s28  ;;  %s76_s30 = int_to_ptr.vmem [resolvable:$true] %s75_s30 }
  0x10   :  { %s3128_s23 = sld [smem:[#allocation30_spill]] }
  0x16   :  { %s2197_s1 = scalar_lea.hbm %s3128_s23, 128 }
  0x17   :  { %p2198_p0 = scmp.ne.s32.totalorder %s3128_s23, %s2197_s1  ;;  %p2201_p1 = scmp.lt.u32.totalorder %s2197_s1, %s3128_s23 }
  0x19   :  { %p2203_p2 = pnand %p2201_p1, %p2198_p0 }
  0x1b   :  { %2206 = shalt.err (!%p2203_p2)
}
  0x1c   :  { %s2207_s26 = scalar_lea.vmem %s56_s28, 128  ;;  %p2212_p4 = scmp.lt.s32.totalorder %s56_s28, %s56_s28 }
  0x1d   :  { %p2208_p3 = scmp.ne.s32.totalorder %s56_s28, %s2207_s26  ;;  %p2213_p5 = scmp.lt.s32.totalorder %s2207_s26, %s2207_s26 }
  0x1f   :  { %p2214_p6 = por %p2213_p5, %p2212_p4 }
  0x21   :  { %p2215_p7 = pnand %p2214_p6, %p2208_p3 }
  0x23   :  { %2218 = shalt.err (!%p2215_p7)
}
  0x24   :  { %58 = dma.hbm_to_vmem [thread:$0]  %s3128_s23, 128, %s56_s28, [#allocation6]  }
  0x25   :  { %s3129_s4 = sld [smem:[#allocation32_spill]] }
  0x2b   :  { %s2219_s0 = scalar_lea.hbm %s3129_s4, 16 }
  0x2c   :  { %p2220_p8 = scmp.ne.s32.totalorder %s3129_s4, %s2219_s0  ;;  %p2223_p9 = scmp.lt.u32.totalorder %s2219_s0, %s3129_s4 }
  0x2e   :  { %p2225_p10 = pnand %p2223_p9, %p2220_p8 }
  0x30   :  { %2228 = shalt.err (!%p2225_p10)
}
  0x31   :  { %s2229_s25 = scalar_lea.vmem %s76_s30, 16  ;;  %s2233_s26 = scalar_lea.vmem %s76_s30, 32 }
  0x32   :  { %p2230_p11 = scmp.ne.s32.totalorder %s76_s30, %s2229_s25  ;;  %p2234_p12 = scmp.lt.s32.totalorder %s76_s30, %s76_s30 }
  0x33   :  { %p2235_p13 = scmp.lt.s32.totalorder %s2233_s26, %s2229_s25 }
  0x35   :  { %p2236_p0 = por %p2235_p13, %p2234_p12 }
  0x37   :  { %p2237_p1 = pnand %p2236_p0, %p2230_p11 }
  0x39   :  { %2240 = shalt.err (!%p2237_p1)
}
  0x3a   :  { %78 = dma.hbm_to_vmem [thread:$0]  %s3129_s4, 16, %s76_s30, [#allocation9]  }
  0x3b   :  { %s2477_s2 = smov [#allocation11]   ;;  %s2241_s0 = scalar_lea.hbm %s3096_s8, 16 }
  0x3c   :  { %s99_s27 = sshll.u32 %s2477_s2, 4  ;;  %p2242_p2 = scmp.ne.s32.totalorder %s3096_s8, %s2241_s0  ;;  %s100_s27 = int_to_ptr.vmem [resolvable:$true] %s99_s27 }
  0x3d   :  { %p2245_p3 = scmp.lt.u32.totalorder %s2241_s0, %s3096_s8 }
  0x3f   :  { %p2247_p4 = pnand %p2245_p3, %p2242_p2 }
  0x41   :  { %2250 = shalt.err (!%p2247_p4)
}
  0x42   :  { %s2251_s25 = scalar_lea.vmem %s100_s27, 16  ;;  %s2255_s30 = scalar_lea.vmem %s100_s27, 32 }
  0x43   :  { %p2252_p5 = scmp.ne.s32.totalorder %s100_s27, %s2251_s25  ;;  %p2256_p6 = scmp.lt.s32.totalorder %s100_s27, %s100_s27 }
  0x44   :  { %p2257_p7 = scmp.lt.s32.totalorder %s2255_s30, %s2251_s25 }
  0x46   :  { %p2258_p8 = por %p2257_p7, %p2256_p6 }
  0x48   :  { %p2259_p9 = pnand %p2258_p8, %p2252_p5 }
  0x4a   :  { %2262 = shalt.err (!%p2259_p9)
}
  0x4b   :  { %102 = dma.hbm_to_vmem [thread:$0]  %s3096_s8, 16, %s100_s27, [#allocation12]  }
  0x4c   :  { %s2478_s28 = smov [#allocation14]   ;;  %s2479_s2 = smov [#allocation17]  }
  0x4d   :  { %s124_s23 = sshll.u32 %s2478_s28, 4  ;;  %s146_s3 = sshll.u32 %s2479_s2, 4  ;;  %s125_s23 = int_to_ptr.vmem [resolvable:$true] %s124_s23  ;;  %s147_s3 = int_to_ptr.vmem [resolvable:$true] %s146_s3 }
  0x4e   :  { %s2263_s5 = scalar_lea.hbm %s3101_s13, 2048 }
  0x4f   :  { %p2264_p10 = scmp.ne.s32.totalorder %s3101_s13, %s2263_s5  ;;  %p2267_p11 = scmp.lt.u32.totalorder %s2263_s5, %s3101_s13 }
  0x51   :  { %p2269_p12 = pnand %p2267_p11, %p2264_p10 }
  0x53   :  { %2272 = shalt.err (!%p2269_p12)
}
  0x54   :  { %s2273_s8 = scalar_lea.vmem %s125_s23, 2048  ;;  %p2278_p0 = scmp.lt.s32.totalorder %s125_s23, %s125_s23 }
  0x55   :  { %p2274_p13 = scmp.ne.s32.totalorder %s125_s23, %s2273_s8  ;;  %p2279_p1 = scmp.lt.s32.totalorder %s2273_s8, %s2273_s8 }
  0x57   :  { %p2280_p2 = por %p2279_p1, %p2278_p0 }
  0x59   :  { %p2281_p3 = pnand %p2280_p2, %p2274_p13 }
  0x5b   :  { %2284 = shalt.err (!%p2281_p3)
}
  0x5c   :  { %s3118_s27 = smov 128   ;;  %s3119_s30 = smov 8  }
  0x5d   :  { %130 = dma.hbm_to_vmem [thread:$0]  %s3101_s13, 2048, %s125_s23, [#allocation15], %s3118_s27, %s3118_s27, %s3119_s30  }
  0x5e   :  { %s2285_s29 = scalar_lea.hbm %s3103_s15, 2048 }
  0x5f   :  { %p2286_p4 = scmp.ne.s32.totalorder %s3103_s15, %s2285_s29  ;;  %p2289_p5 = scmp.lt.u32.totalorder %s2285_s29, %s3103_s15 }
  0x61   :  { %p2291_p6 = pnand %p2289_p5, %p2286_p4 }
  0x63   :  { %2294 = shalt.err (!%p2291_p6)
}
  0x64   :  { %s2295_s6 = scalar_lea.vmem %s147_s3, 2048  ;;  %p2300_p8 = scmp.lt.s32.totalorder %s147_s3, %s147_s3 }
  0x65   :  { %p2296_p7 = scmp.ne.s32.totalorder %s147_s3, %s2295_s6  ;;  %p2301_p9 = scmp.lt.s32.totalorder %s2295_s6, %s2295_s6 }
  0x67   :  { %p2302_p10 = por %p2301_p9, %p2300_p8 }
  0x69   :  { %p2303_p11 = pnand %p2302_p10, %p2296_p7 }
  0x6b   :  { %2306 = shalt.err (!%p2303_p11)
}
  0x6c   :  { %s3120_s13 = smov 64   ;;  %s2483_s23 = smov 4  }
  0x6d   :  { %152 = dma.hbm_to_vmem [thread:$0]  %s3103_s15, 2048, %s147_s3, [#allocation18], %s3120_s13, %s3120_s13, %s2483_s23  }
  0x6e   :  { %s2484_s4 = smov [#allocation2]   ;;  %s2485_s28 = smov [#allocation7]  }
  0x6f   :  { %s40_s26 = sshll.u32 %s2484_s4, 4  ;;  %s65_s2 = sshll.u32 %s2485_s28, 4  ;;  %s41_s26 = int_to_ptr.vmem [resolvable:$true] %s40_s26  ;;  %s66_s2 = int_to_ptr.vmem [resolvable:$true] %s65_s2 }
  0x70   :  { %s3130_s5 = sld [smem:[#allocation28_spill]] }
  0x76   :  { %s2307_s24 = scalar_lea.hbm %s3130_s5, 256 }
  0x77   :  { %p2308_p12 = scmp.ne.s32.totalorder %s3130_s5, %s2307_s24  ;;  %p2311_p13 = scmp.lt.u32.totalorder %s2307_s24, %s3130_s5 }
  0x79   :  { %p2313_p0 = pnand %p2311_p13, %p2308_p12 }
  0x7b   :  { %2316 = shalt.err (!%p2313_p0)
}
  0x7c   :  { %s2317_s15 = scalar_lea.vmem %s41_s26, 256  ;;  %p2322_p2 = scmp.lt.s32.totalorder %s41_s26, %s41_s26 }
  0x7d   :  { %p2318_p1 = scmp.ne.s32.totalorder %s41_s26, %s2317_s15  ;;  %p2323_p3 = scmp.lt.s32.totalorder %s2317_s15, %s2317_s15 }
  0x7f   :  { %p2324_p4 = por %p2323_p3, %p2322_p2 }
  0x81   :  { %p2325_p5 = pnand %p2324_p4, %p2318_p1 }
  0x83   :  { %2328 = shalt.err (!%p2325_p5)
}
  0x84   :  { %s3131_s3 = smov 8   ;;  %s3132_s25 = smov 128  }
  0x85   :  { %46 = dma.hbm_to_vmem [thread:$0]  %s3130_s5, 256, %s41_s26, [#allocation3], %s3132_s25, %s3132_s25, %s3131_s3  }
  0x86   :  { %s3133_s30 = sld [smem:[#allocation31_spill]] }
  0x8c   :  { %s2329_s29 = scalar_lea.hbm %s3133_s30, 16 }
  0x8d   :  { %p2330_p6 = scmp.ne.s32.totalorder %s3133_s30, %s2329_s29  ;;  %p2333_p7 = scmp.lt.u32.totalorder %s2329_s29, %s3133_s30 }
  0x8f   :  { %p2335_p8 = pnand %p2333_p7, %p2330_p6 }
  0x91   :  { %2338 = shalt.err (!%p2335_p8)
}
  0x92   :  { %s2339_s15 = scalar_lea.vmem %s66_s2, 16  ;;  %s2343_s13 = scalar_lea.vmem %s66_s2, 32 }
  0x93   :  { %p2340_p9 = scmp.ne.s32.totalorder %s66_s2, %s2339_s15  ;;  %p2344_p10 = scmp.lt.s32.totalorder %s66_s2, %s66_s2 }
  0x94   :  { %p2345_p11 = scmp.lt.s32.totalorder %s2343_s13, %s2339_s15 }
  0x96   :  { %p2346_p12 = por %p2345_p11, %p2344_p10 }
  0x98   :  { %p2347_p13 = pnand %p2346_p12, %p2340_p9 }
  0x9a   :  { %2350 = shalt.err (!%p2347_p13)
}
  0x9b   :  { %68 = dma.hbm_to_vmem [thread:$0]  %s3133_s30, 16, %s66_s2, [#allocation6]  }
  0x9c   :  { %s2486_s3 = smov [#allocation10]   ;;  %s2487_s8 = smov [#allocation13]  }
  0x9d   :  { %s87_s25 = sshll.u32 %s2486_s3, 4  ;;  %s111_s4 = sshll.u32 %s2487_s8, 4  ;;  %s88_s25 = int_to_ptr.vmem [resolvable:$true] %s87_s25  ;;  %s112_s4 = int_to_ptr.vmem [resolvable:$true] %s111_s4 }
  0x9e   :  { %s3134_s29 = sld [smem:[#allocation34_spill]] }
  0xa4   :  { %s2351_s0 = scalar_lea.hbm %s3134_s29, 32 }
  0xa5   :  { %p2352_p0 = scmp.ne.s32.totalorder %s3134_s29, %s2351_s0  ;;  %p2355_p1 = scmp.lt.u32.totalorder %s2351_s0, %s3134_s29 }
  0xa7   :  { %p2357_p2 = pnand %p2355_p1, %p2352_p0 }
  0xa9   :  { %2360 = shalt.err (!%p2357_p2)
}
  0xaa   :  { %s2361_s2 = scalar_lea.vmem %s88_s25, 32  ;;  %p2366_p4 = scmp.lt.s32.totalorder %s88_s25, %s88_s25 }
  0xab   :  { %p2362_p3 = scmp.ne.s32.totalorder %s88_s25, %s2361_s2  ;;  %p2367_p5 = scmp.lt.s32.totalorder %s2361_s2, %s2361_s2 }
  0xad   :  { %p2368_p6 = por %p2367_p5, %p2366_p4 }
  0xaf   :  { %p2369_p7 = pnand %p2368_p6, %p2362_p3 }
  0xb1   :  { %2372 = shalt.err (!%p2369_p7)
}
  0xb2   :  { %90 = dma.hbm_to_vmem [thread:$0]  %s3134_s29, 32, %s88_s25, [#allocation9]  }
  0xb3   :  { %s2373_s3 = scalar_lea.hbm %s3098_s10, 16 }
  0xb4   :  { %p2374_p8 = scmp.ne.s32.totalorder %s3098_s10, %s2373_s3  ;;  %p2377_p9 = scmp.lt.u32.totalorder %s2373_s3, %s3098_s10 }
  0xb6   :  { %p2379_p10 = pnand %p2377_p9, %p2374_p8 }
  0xb8   :  { %2382 = shalt.err (!%p2379_p10)
}
  0xb9   :  { %s2383_s24 = scalar_lea.vmem %s112_s4, 16  ;;  %s2387_s1 = scalar_lea.vmem %s112_s4, 32 }
  0xba   :  { %p2384_p11 = scmp.ne.s32.totalorder %s112_s4, %s2383_s24  ;;  %p2388_p12 = scmp.lt.s32.totalorder %s112_s4, %s112_s4 }
  0xbb   :  { %p2389_p13 = scmp.lt.s32.totalorder %s2387_s1, %s2383_s24 }
  0xbd   :  { %p2390_p0 = por %p2389_p13, %p2388_p12 }
  0xbf   :  { %p2391_p1 = pnand %p2390_p0, %p2384_p11 }
  0xc1   :  { %2394 = shalt.err (!%p2391_p1)
}
  0xc2   :  { %114 = dma.hbm_to_vmem [thread:$0]  %s3098_s10, 16, %s112_s4, [#allocation12]  }
  0xc3   :  { %s2488_s13 = smov [#allocation16]   ;;  %s2489_s2 = smov [#allocation19]  }
  0xc4   :  { %s137_s6 = sshll.u32 %s2488_s13, 4  ;;  %s160_s30 = sshll.u32 %s2489_s2, 4  ;;  %s138_s6 = int_to_ptr.vmem [resolvable:$true] %s137_s6  ;;  %s161_s30 = int_to_ptr.vmem [resolvable:$true] %s160_s30 }
  0xc5   :  { %s2395_s5 = scalar_lea.hbm %s3102_s14, 32 }
  0xc6   :  { %p2396_p2 = scmp.ne.s32.totalorder %s3102_s14, %s2395_s5  ;;  %p2399_p3 = scmp.lt.u32.totalorder %s2395_s5, %s3102_s14 }
  0xc8   :  { %p2401_p4 = pnand %p2399_p3, %p2396_p2 }
  0xca   :  { %2404 = shalt.err (!%p2401_p4)
}
  0xcb   :  { %s2405_s10 = scalar_lea.vmem %s138_s6, 32  ;;  %p2410_p6 = scmp.lt.s32.totalorder %s138_s6, %s138_s6 }
  0xcc   :  { %p2406_p5 = scmp.ne.s32.totalorder %s138_s6, %s2405_s10  ;;  %p2411_p7 = scmp.lt.s32.totalorder %s2405_s10, %s2405_s10 }
  0xce   :  { %p2412_p8 = por %p2411_p7, %p2410_p6 }
  0xd0   :  { %p2413_p9 = pnand %p2412_p8, %p2406_p5 }
  0xd2   :  { %2416 = shalt.err (!%p2413_p9)
}
  0xd3   :  { %140 = dma.hbm_to_vmem [thread:$0]  %s3102_s14, 32, %s138_s6, [#allocation15]  }
  0xd4   :  { %s2417_s25 = scalar_lea.hbm %s3105_s17, 1024 }
  0xd5   :  { %p2418_p10 = scmp.ne.s32.totalorder %s3105_s17, %s2417_s25  ;;  %p2421_p11 = scmp.lt.u32.totalorder %s2417_s25, %s3105_s17 }
  0xd7   :  { %p2423_p12 = pnand %p2421_p11, %p2418_p10 }
  0xd9   :  { %2426 = shalt.err (!%p2423_p12)
}
  0xda   :  { %s2427_s26 = scalar_lea.vmem %s161_s30, 1024  ;;  %p2432_p0 = scmp.lt.s32.totalorder %s161_s30, %s161_s30 }
  0xdb   :  { %p2428_p13 = scmp.ne.s32.totalorder %s161_s30, %s2427_s26  ;;  %p2433_p1 = scmp.lt.s32.totalorder %s2427_s26, %s2427_s26 }
  0xdd   :  { %p2434_p2 = por %p2433_p1, %p2432_p0 }
  0xdf   :  { %p2435_p3 = pnand %p2434_p2, %p2428_p13 }
  0xe1   :  { %2438 = shalt.err (!%p2435_p3)
}
  0xe2   :  { %s3135_s14 = smov 64  }
  0xe3   :  { %166 = dma.hbm_to_vmem [thread:$0]  %s3105_s17, 1024, %s161_s30, [#allocation18], %s3135_s14, %s3135_s14, %s2483_s23  }
  0xe4   :  { %2461 = dma.done.wait [#allocation3], 256  }
  0xe5   :  { %2462 = vsyncadd [#allocation3], 4294967040 }
  0xe6   :  { %2463 = dma.done.wait [#allocation6], 144  }
  0xe7   :  { %2464 = vsyncadd [#allocation6], 4294967152 }
  0xe8   :  { %2465 = dma.done.wait [#allocation9], 48  }
  0xe9   :  { %2466 = vsyncadd [#allocation9], 4294967248 }
  0xea   :  { %2467 = dma.done.wait [#allocation12], 32  }
  0xeb   :  { %2468 = vsyncadd [#allocation12], 4294967264 }
  0xec   :  { %2469 = dma.done.wait [#allocation15], 2080  }
  0xed   :  { %2470 = vsyncadd [#allocation15], 4294965216 }
  0xee   :  { %2471 = dma.done.wait [#allocation18], 3072  }
  0xef   :  { %2472 = vsyncadd [#allocation18], 4294964224  ;;  %v2490_v0 = vmov 0   ;;  %s3136_s28 = sld [smem:[#allocation33_spill]]  ;;  %v2113_v10 = vld [vmem:[%s3095_s7 + $0x40] sm:$0xff]   ;;  %v2115_v13 = vld [vmem:[%s3095_s7 + $0x48] sm:$0xff]   ;;  %v311_v41 = vlaneseq }
  0xf0   :  { %353 = vmatprep.mubr.bf16.mxu0 %v2490_v0  ;;  %v2114_v11 = vld [vmem:[%s3095_s7] sm:$0xff]   ;;  %1769 = vmatprep.subr.bf16.mxu1 %v2113_v10  ;;  %v2116_v14 = vld [vmem:[%s3095_s7 + $0x8] sm:$0xff]   ;;  %v2117_v15 = vld [vmem:[%s3095_s7 + $0x50] sm:$0xff]   ;;  %v2491_v35 = vmov 0.0   ;;  %vm2492_vm0 = vmmov 0   ;;  %vm1351_vm1 = vcmask 130048  }
  0xf1   :  { %1770 = vmatpush3.bf16.msra.mxu1 %v2114_v11  ;;  %v2118_v18 = vld [vmem:[%s3095_s7 + $0x10] sm:$0xff]   ;;  %v2119_v19 = vld [vmem:[%s3095_s7 + $0x58] sm:$0xff]   ;;  %v2121_v24 = vld [vmem:[%s3095_s7 + $0x60] sm:$0xff]   ;;  %v2876_v42 = vshrl.u32 %v311_v41, 7  ;;  %vm1265_vm2 = vcmask 64512   ;;  %s3137_s6 = sld [smem:[#allocation29_spill]] }
  0xf2   :  { %1771 = vmatprep.subr.bf16.mxu1 %v2115_v13  ;;  %v2120_v23 = vld [vmem:[%s3095_s7 + $0x18] sm:$0xff]   ;;  %v2122_v25 = vld [vmem:[%s3095_s7 + $0x20] sm:$0xff]   ;;  %v2123_v27 = vld [vmem:[%s3095_s7 + $0x68] sm:$0xff]  }
  0xf3   :  { %v2124_v28 = vld [vmem:[%s3095_s7 + $0x28] sm:$0xff]   ;;  %v212_v29 = vld [vmem:[#allocation7] sm:$0x1]  ;;  %v2125_v30 = vld [vmem:[%s3095_s7 + $0x70] sm:$0xff]   ;;  %v2879_v43 = vsub.s32 0, %v2876_v42  ;;  %v317_v45 = vsub.s32 1, %v2876_v42 }
  0xf4   :  { %v2126_v31 = vld [vmem:[%s3095_s7 + $0x30] sm:$0xff]   ;;  %v2127_v32 = vld [vmem:[%s3095_s7 + $0x78] sm:$0xff]   ;;  %v2129_v34 = vld [vmem:[%s3097_s9] sm:$0xff]  }
  0xf5   :  { %v2089_v1 = vld [vmem:[%s3136_s28 + $0x4] ss:$8 sps:$4 sm:$0xff]   ;;  %v2091_v2 = vld [vmem:[%s3136_s28] ss:$8 sps:$4 sm:$0xff]   ;;  %v2092_v3 = vld [vmem:[%s3136_s28 + $0x14] ss:$8 sps:$4 sm:$0xff]   ;;  %1772 = vmatpush3.bf16.msra.mxu1 %v2116_v14 }
  0xf6   :  { %321 = vmatprep.subr.bf16.mxu0 %v2089_v1  ;;  %v2094_v4 = vld [vmem:[%s3136_s28 + $0x10] ss:$8 sps:$4 sm:$0xff]   ;;  %v2095_v5 = vld [vmem:[%s3136_s28 + $0x24] ss:$8 sps:$4 sm:$0xff]   ;;  %v2097_v6 = vld [vmem:[%s3136_s28 + $0x20] ss:$8 sps:$4 sm:$0xff]   ;;  %1773 = vmatprep.subr.bf16.mxu1 %v2117_v15 }
  0xf7   :  { %322 = vmatpush1.bf16.msra.mxu0 %v2091_v2  ;;  %v2098_v7 = vld [vmem:[%s3136_s28 + $0x34] ss:$8 sps:$4 sm:$0xff]   ;;  %v2100_v8 = vld [vmem:[%s3136_s28 + $0x30] ss:$8 sps:$4 sm:$0xff]   ;;  %v2101_v9 = vld [vmem:[%s3136_s28 + $0x44] ss:$8 sps:$4 sm:$0xff]  }
  0xf8   :  { %323 = vmatprep.subr.bf16.mxu0 %v2092_v3  ;;  %v2103_v12 = vld [vmem:[%s3136_s28 + $0x40] ss:$8 sps:$4 sm:$0xff]   ;;  %v2104_v16 = vld [vmem:[%s3136_s28 + $0x54] ss:$8 sps:$4 sm:$0xff]   ;;  %v2106_v17 = vld [vmem:[%s3136_s28 + $0x50] ss:$8 sps:$4 sm:$0xff]  }
  0xf9   :  { %v2107_v20 = vld [vmem:[%s3136_s28 + $0x64] ss:$8 sps:$4 sm:$0xff]   ;;  %v2109_v21 = vld [vmem:[%s3136_s28 + $0x60] ss:$8 sps:$4 sm:$0xff]   ;;  %v2110_v22 = vld [vmem:[%s3136_s28 + $0x74] ss:$8 sps:$4 sm:$0xff]   ;;  %1774 = vmatpush3.bf16.msra.mxu1 %v2118_v18 }
  0xfa   :  { %1775 = vmatprep.subr.bf16.mxu1 %v2119_v19  ;;  %v2112_v26 = vld [vmem:[%s3136_s28 + $0x70] ss:$8 sps:$4 sm:$0xff]   ;;  %v2130_v36 = vld [vmem:[%s3097_s9 + $0x8] sm:$0xff]   ;;  %v2133_v39 = vld [vmem:[%s3097_s9 + $0x20] sm:$0xff]  }
  0xfb   :  { %324 = vmatpush1.bf16.msra.mxu0 %v2094_v4  ;;  %v2128_v33 = vld [vmem:[%s3095_s7 + $0x38] sm:$0xff]   ;;  %v2131_v37 = vld [vmem:[%s3097_s9 + $0x10] sm:$0xff]   ;;  %v2134_v40 = vld [vmem:[%s3097_s9 + $0x28] sm:$0xff]  }
  0xfc   :  { %325 = vmatprep.subr.bf16.mxu0 %v2095_v5  ;;  %v2132_v38 = vld [vmem:[%s3097_s9 + $0x18] sm:$0xff]   ;;  %v2135_v58 = vld [vmem:[%s3097_s9 + $0x30] sm:$0xff]   ;;  %v651_v61 = vld [vmem:[%s3100_s12] sm:$0xff] }
  0xfd   :  { %1776 = vmatpush3.bf16.msra.mxu1 %v2120_v23  ;;  %v229_v44 = vld [vmem:[#allocation10] sm:$0x3]  ;;  %v2139_v60 = vld [vmem:[#allocation14 + $0x4] ss:$8 sps:$4 sm:$0xff]  }
  0xfe   :  { %1777 = vmatprep.subr.bf16.mxu1 %v2121_v24  ;;  %v314_v46 = vrot.slane %v229_v44, %v2879_v43  ;;  %v318_v47 = vrot.slane %v229_v44, %v317_v45  ;;  %v2136_v59 = vld [vmem:[%s3097_s9 + $0x38] sm:$0xff]   ;;  %v652_v62 = vld [vmem:[%s3100_s12 + $0x8] sm:$0xff]  ;;  %v653_v63 = vld [vmem:[%s3100_s12 + $0x10] sm:$0xff] }
  0xff   :  { %326 = vmatpush1.bf16.msra.mxu0 %v2097_v6  ;;  %v2010_v1 = vpack.c.bf16 %v652_v62, %v651_v61  ;;  %v654_v2 = vld [vmem:[%s3100_s12 + $0x18] sm:$0xff]  ;;  %v655_v4 = vld [vmem:[%s3100_s12 + $0x20] sm:$0xff]  ;;  %v656_v5 = vld [vmem:[%s3100_s12 + $0x28] sm:$0xff] }
 0x100   :  { %327 = vmatprep.subr.bf16.mxu0 %v2098_v7  ;;  %v2014_v3 = vpack.c.bf16 %v654_v2, %v653_v63  ;;  %v2018_v6 = vpack.c.bf16 %v656_v5, %v655_v4  ;;  %v657_v7 = vld [vmem:[%s3100_s12 + $0x30] sm:$0xff]  ;;  %v659_v10 = vld [vmem:[%s3100_s12 + $0x40] sm:$0xff]  ;;  %v660_v11 = vld [vmem:[%s3100_s12 + $0x48] sm:$0xff] }
 0x101   :  { %1778 = vmatpush3.bf16.msra.mxu1 %v2122_v25  ;;  %v661_v13 = vld [vmem:[%s3100_s12 + $0x50] sm:$0xff]  ;;  %v662_v14 = vld [vmem:[%s3100_s12 + $0x58] sm:$0xff]  ;;  %v2137_v24 = vld [vmem:[#allocation14] ss:$8 sps:$4 sm:$0xff]  }
 0x102   :  { %1779 = vmatprep.subr.bf16.mxu1 %v2123_v27  ;;  %v2030_v15 = vpack.c.bf16 %v662_v14, %v661_v13  ;;  %v2140_v27 = vld [vmem:[#allocation14 + $0x10] ss:$8 sps:$4 sm:$0xff]   ;;  %v663_v41 = vld [vmem:[%s3100_s12 + $0x60] sm:$0xff]  ;;  %v664_v44 = vld [vmem:[%s3100_s12 + $0x68] sm:$0xff] }
 0x103   :  { %328 = vmatpush1.bf16.msra.mxu0 %v2100_v8  ;;  %v658_v8 = vld [vmem:[%s3100_s12 + $0x38] sm:$0xff]  ;;  %v2162_v63 = vld [vmem:[#allocation17] sm:$0xff]   ;;  %v2164_v2 = vld [vmem:[#allocation17 + $0x8] sm:$0xff]  }
 0x104   :  { %329 = vmatprep.subr.bf16.mxu0 %v2101_v9  ;;  %v2022_v9 = vpack.c.bf16 %v658_v8, %v657_v7  ;;  %v2166_v4 = vld [vmem:[#allocation17 + $0x10] sm:$0xff]   ;;  %v2167_v5 = vld [vmem:[#allocation17 + $0x58] sm:$0xff]   ;;  %v2169_v7 = vld [vmem:[#allocation17 + $0x60] sm:$0xff]  }
 0x105   :  { %1780 = vmatpush3.bf16.msra.mxu1 %v2124_v28  ;;  %v2145_v28 = vld [vmem:[#allocation14 + $0x24] ss:$8 sps:$4 sm:$0xff]  }
 0x106   :  { %1781 = vmatprep.subr.bf16.mxu1 %v2125_v30  ;;  %v2148_v30 = vld [vmem:[#allocation14 + $0x34] ss:$8 sps:$4 sm:$0xff]   ;;  %v2170_v8 = vld [vmem:[#allocation17 + $0x20] sm:$0xff]  }
 0x107   :  { %330 = vmatpush1.bf16.msra.mxu0 %v2103_v12  ;;  %v2026_v12 = vpack.c.bf16 %v660_v11, %v659_v10  ;;  %v759_v10 = vld [vmem:[#allocation16] sm:$0x3]  ;;  %v2172_v11 = vld [vmem:[#allocation17 + $0x28] sm:$0xff]   ;;  %v2177_v42 = vld [vmem:[#allocation19] sm:$0xff]  }
 0x108   :  { %331 = vmatprep.subr.bf16.mxu0 %v2104_v16  ;;  %v844_v13 = vrot.slane %v759_v10, %v2879_v43  ;;  %v848_v14 = vrot.slane %v759_v10, %v317_v45  ;;  %v2178_v45 = vld [vmem:[#allocation19 + $0x8] sm:$0xff]  }
 0x109   :  { %1782 = vmatpush3.bf16.msra.mxu1 %v2126_v31  ;;  %v2146_v31 = vld [vmem:[#allocation14 + $0x30] ss:$8 sps:$4 sm:$0xff]  }
 0x10a   :  { %1783 = vmatprep.subr.bf16.mxu1 %v2127_v32  ;;  %v2151_v32 = vld [vmem:[#allocation14 + $0x44] ss:$8 sps:$4 sm:$0xff]  }
 0x10b   :  { %332 = vmatpush1.bf16.msra.mxu0 %v2106_v17  ;;  %v398_v17 = vld [vmem:[#allocation11] sm:$0x1]  ;;  %v3028_v10 = vld [vmem:[#allocation5] sm:$0xff] }
 0x10c   :  { %333 = vmatprep.subr.bf16.mxu0 %v2107_v20 }
 0x10d   :  { %1784 = vmatpush3.bf16.msra.mxu1 %v2128_v33  ;;  %v2149_v33 = vld [vmem:[#allocation14 + $0x40] ss:$8 sps:$4 sm:$0xff]  }
 0x10e   :  { %2011 = vmatprep.subr.bf16.mxu1 %v2010_v1 }
 0x10f   :  { %334 = vmatpush1.bf16.msra.mxu0 %v2109_v21 }
 0x110   :  { %335 = vmatprep.subr.bf16.mxu0 %v2110_v22 }
 0x113   :  { %336 = vmatpush1.bf16.msra.mxu0 %v2112_v26  ;;  %v2142_v26 = vld [vmem:[#allocation14 + $0x14] ss:$8 sps:$4 sm:$0xff]  }
 0x114   :  { %1878 = vmatprep.subr.bf16.mxu0 %v2491_v35 }
 0x116   :  { %354 = vmatmul.mubr.bf16.vlgmr.msra.gmra.mrb[0].mxu0 %v212_v29  ;;  %v2143_v29 = vld [vmem:[#allocation14 + $0x20] ss:$8 sps:$4 sm:$0xff]  }
 0x117   :  { %1879 = vmatpush3.bf16.msra.mxu0 %v2129_v34  ;;  %1894 = vmatprep.mubr.msk.bf16.mxu0 %vm2492_vm0, %v2491_v35  ;;  %v2154_v34 = vld [vmem:[#allocation14 + $0x54] ss:$8 sps:$4 sm:$0xff]  }
 0x118   :  { %1880 = vmatprep.subr.bf16.mxu0 %v2491_v35 }
 0x11b   :  { %1881 = vmatpush3.bf16.msra.mxu0 %v2130_v36  ;;  %v2152_v36 = vld [vmem:[#allocation14 + $0x50] ss:$8 sps:$4 sm:$0xff]  }
 0x11c   :  { %1882 = vmatprep.subr.bf16.mxu0 %v2491_v35 }
 0x11f   :  { %1883 = vmatpush3.bf16.msra.mxu0 %v2131_v37  ;;  %v2157_v37 = vld [vmem:[#allocation14 + $0x64] ss:$8 sps:$4 sm:$0xff]  }
 0x120   :  { %1884 = vmatprep.subr.bf16.mxu0 %v2491_v35 }
 0x123   :  { %1885 = vmatpush3.bf16.msra.mxu0 %v2132_v38  ;;  %v2160_v38 = vld [vmem:[#allocation14 + $0x74] ss:$8 sps:$4 sm:$0xff]  }
 0x124   :  { %1886 = vmatprep.subr.bf16.mxu0 %v2491_v35 }
 0x127   :  { %1887 = vmatpush3.bf16.msra.mxu0 %v2133_v39  ;;  %v2158_v39 = vld [vmem:[#allocation14 + $0x70] ss:$8 sps:$4 sm:$0xff]  }
 0x128   :  { %1888 = vmatprep.subr.bf16.mxu0 %v2491_v35 }
 0x12b   :  { %1889 = vmatpush3.bf16.msra.mxu0 %v2134_v40  ;;  %v742_v40 = vld [vmem:[#allocation8] sm:$0x1] }
 0x12c   :  { %1890 = vmatprep.subr.bf16.mxu0 %v2491_v35 }
 0x12f   :  { %1891 = vmatpush3.bf16.msra.mxu0 %v2135_v58  ;;  %v644_v58 = vld [vmem:[%s3099_s11 + $0x8] sm:$0xff] }
 0x130   :  { %1892 = vmatprep.subr.bf16.mxu0 %v2491_v35 }
 0x133   :  { %1893 = vmatpush3.bf16.msra.mxu0 %v2136_v59  ;;  %v643_v59 = vld [vmem:[%s3099_s11] sm:$0xff] }
 0x134   :  { %851 = vmatprep.subr.bf16.mxu0 %v2139_v60 }
 0x1e9   :  { %v355_v48 = vpop.f32.mrb[0].mxu0 }
 0x1ea   :  { %v356_v49 = vadd.f32 %v355_v48, %v314_v46  ;;  %v357_v50 = vpop.f32.mrb[1].mxu0  ;;  %v2034_v46 = vpack.c.bf16 %v664_v44, %v663_v41  ;;  %v666_v48 = vld [vmem:[%s3100_s12 + $0x78] sm:$0xff]  ;;  %v1183_v41 = vld [vmem:[%s3108_s20 + $0x20] sm:$0xff]  ;;  %v1184_v44 = vld [vmem:[%s3108_s20 + $0x28] sm:$0xff] }
 0x1eb   :  { %v358_v51 = vadd.f32 %v357_v50, %v318_v47  ;;  %v359_v52 = vpop.f32.mrb[2].mxu0  ;;  %v665_v47 = vld [vmem:[%s3100_s12 + $0x70] sm:$0xff]  ;;  %v2161_v50 = vld [vmem:[#allocation17 + $0x40] sm:$0xff]  }
 0x1ec   :  { %v362_v53 = vmax.f32 %v356_v49, 0.0  ;;  %v360_v54 = vpop.f32.mrb[3].mxu0  ;;  %v2038_v49 = vpack.c.bf16 %v666_v48, %v665_v47  ;;  %v1185_v47 = vld [vmem:[%s3108_s20 + $0x30] sm:$0xff]  ;;  %v1186_v48 = vld [vmem:[%s3108_s20 + $0x38] sm:$0xff] }
 0x1ed   :  { %v363_v55 = vmax.f32 %v358_v51, 0.0  ;;  %v553_v51 = vld [vmem:[#allocation13] sm:$0x1] }
 0x1ee   :  { %v364_v57 = vpack.c.bf16 %v362_v53, %v362_v53 }
 0x1ef   :  { %v365_v56 = vpack.c.bf16 %v363_v55, %v363_v55 }
 0x1f1   :  { %527 = vmatprep.mubr.bf16.mxu1 %v365_v56 }
 0x1f2   :  { %528 = vmatmul.mubr.bf16.vlgmr.msra.gmra.mrb[0].mxu1 %v364_v57 }
 0x1f3   :  { %2013 = vmatpush3.bf16.msra.mxu1 %v2010_v1  ;;  %v2163_v1 = vld [vmem:[#allocation17 + $0x48] sm:$0xff]  }
 0x1f4   :  { %2015 = vmatprep.subr.bf16.mxu1 %v2014_v3 }
 0x1f7   :  { %2017 = vmatpush3.bf16.msra.mxu1 %v2014_v3  ;;  %v2165_v3 = vld [vmem:[#allocation17 + $0x50] sm:$0xff]  }
 0x1f8   :  { %2019 = vmatprep.subr.bf16.mxu1 %v2018_v6 }
 0x1fb   :  { %2021 = vmatpush3.bf16.msra.mxu1 %v2018_v6  ;;  %v2168_v6 = vld [vmem:[#allocation17 + $0x18] sm:$0xff]  }
 0x1fc   :  { %2023 = vmatprep.subr.bf16.mxu1 %v2022_v9 }
 0x1ff   :  { %2025 = vmatpush3.bf16.msra.mxu1 %v2022_v9  ;;  %v2171_v9 = vld [vmem:[#allocation17 + $0x68] sm:$0xff]  }
 0x200   :  { %2027 = vmatprep.subr.bf16.mxu1 %v2026_v12 }
 0x203   :  { %2029 = vmatpush3.bf16.msra.mxu1 %v2026_v12  ;;  %v2173_v12 = vld [vmem:[#allocation17 + $0x70] sm:$0xff]  }
 0x204   :  { %2031 = vmatprep.subr.bf16.mxu1 %v2030_v15 }
 0x207   :  { %2033 = vmatpush3.bf16.msra.mxu1 %v2030_v15  ;;  %v2174_v15 = vld [vmem:[#allocation17 + $0x30] sm:$0xff]  }
 0x208   :  { %2035 = vmatprep.subr.bf16.mxu1 %v2034_v46 }
 0x20b   :  { %2037 = vmatpush3.bf16.msra.mxu1 %v2034_v46  ;;  %v2049_v46 = vpack.c.bf16 %v1184_v44, %v1183_v41 }
 0x20c   :  { %2039 = vmatprep.subr.bf16.mxu1 %v2038_v49 }
 0x20f   :  { %2041 = vmatpush3.bf16.msra.mxu1 %v2038_v49  ;;  %v2052_v49 = vpack.c.bf16 %v1186_v48, %v1185_v47 }
 0x210   :  { %1818 = vmatprep.subr.bf16.mxu1 %v2161_v50  ;;  %v1187_v50 = vld [vmem:[%s3108_s20 + $0x40] sm:$0xff] }
 0x2c5   :  { %v1785_v16 = vpop.f32.mrb[0].mxu1 }
 0x2c6   :  { %v1786_v18 = vpop.f32.mrb[1].mxu1 }
 0x2c7   :  { %v1787_v19 = vadd.f32 %v1786_v18, %v1785_v16  ;;  %v1788_v20 = vpop.f32.mrb[2].mxu1 }
 0x2c8   :  { %v1789_v21 = vpop.f32.mrb[3].mxu1 }
 0x2c9   :  { %v530_v22 = vadd.f32 %v1787_v19, %v398_v17  ;;  %v2175_v17 = vld [vmem:[#allocation17 + $0x78] sm:$0xff]  }
 0x2cb   :  { %v535_v23 = vmax.f32 %v530_v22, 0.0 }
 0x2cd   :  { %v536_v25 = vpack.c.bf16 %v535_v23, %v535_v23  ;;  %v2176_v23 = vld [vmem:[#allocation17 + $0x38] sm:$0xff]  }
 0x2cf   :  { %1895 = vmatmul.mubr.bf16.vlgmr.msra.gmra.mrb[4].mxu0 %v536_v25 }
 0x2d0   :  { %852 = vmatpush1.bf16.msra.mxu0 %v2137_v24  ;;  %883 = vmatprep.mubr.bf16.mxu0 %v2490_v0  ;;  %v2155_v0 = vld [vmem:[#allocation14 + $0x60] ss:$8 sps:$4 sm:$0xff]  }
 0x2d1   :  { %853 = vmatprep.subr.bf16.mxu0 %v2142_v26 }
 0x2d4   :  { %854 = vmatpush1.bf16.msra.mxu0 %v2140_v27 }
 0x2d5   :  { %855 = vmatprep.subr.bf16.mxu0 %v2145_v28  ;;  %v2179_v28 = vld [vmem:[#allocation19 + $0x10] sm:$0xff]  }
 0x2d8   :  { %856 = vmatpush1.bf16.msra.mxu0 %v2143_v29  ;;  %v2180_v29 = vld [vmem:[#allocation19 + $0x18] sm:$0xff]  }
 0x2d9   :  { %857 = vmatprep.subr.bf16.mxu0 %v2148_v30  ;;  %v2181_v30 = vld [vmem:[#allocation19 + $0x20] sm:$0xff]  }
 0x2dc   :  { %858 = vmatpush1.bf16.msra.mxu0 %v2146_v31  ;;  %v2182_v31 = vld [vmem:[#allocation19 + $0x28] sm:$0xff]  }
 0x2dd   :  { %859 = vmatprep.subr.bf16.mxu0 %v2151_v32  ;;  %v2183_v32 = vld [vmem:[#allocation19 + $0x30] sm:$0xff]  }
 0x2e0   :  { %860 = vmatpush1.bf16.msra.mxu0 %v2149_v33  ;;  %v2184_v33 = vld [vmem:[#allocation19 + $0x38] sm:$0xff]  }
 0x2e1   :  { %861 = vmatprep.subr.bf16.mxu0 %v2154_v34  ;;  %v1179_v34 = vld [vmem:[%s3108_s20] sm:$0xff] }
 0x2e4   :  { %862 = vmatpush1.bf16.msra.mxu0 %v2152_v36  ;;  %v1180_v36 = vld [vmem:[%s3108_s20 + $0x8] sm:$0xff] }
 0x2e5   :  { %863 = vmatprep.subr.bf16.mxu0 %v2157_v37  ;;  %v1181_v37 = vld [vmem:[%s3108_s20 + $0x10] sm:$0xff] }
 0x2e8   :  { %864 = vmatpush1.bf16.msra.mxu0 %v2155_v0  ;;  %v2493_v0 = vmov 0.0|0.0  }
 0x2e9   :  { %865 = vmatprep.subr.bf16.mxu0 %v2160_v38  ;;  %v2043_v38 = vpack.c.bf16 %v1180_v36, %v1179_v34 }
 0x2ec   :  { %866 = vmatpush1.bf16.msra.mxu0 %v2158_v39  ;;  %v1182_v39 = vld [vmem:[%s3108_s20 + $0x18] sm:$0xff] }
 0x2ed   :  { %1933 = vmatprep.subr.bf16.mxu0 %v2491_v35 }
 0x2ef   :  { %884 = vmatmul.mubr.bf16.vlgmr.msra.gmra.mrb[8].mxu0 %v742_v40  ;;  %v2046_v40 = vpack.c.bf16 %v1182_v39, %v1181_v37 }
 0x2f0   :  { %1949 = vmatprep.mubr.msk.bf16.mxu0 %vm2492_vm0, %v2491_v35  ;;  %1934 = vmatpush3.bf16.msra.mxu0 %v2177_v42 }
 0x2f1   :  { %1935 = vmatprep.subr.bf16.mxu0 %v2491_v35 }
 0x2f4   :  { %1936 = vmatpush3.bf16.msra.mxu0 %v2178_v45 }
 0x2f5   :  { %1937 = vmatprep.subr.bf16.mxu0 %v2491_v35 }
 0x2f8   :  { %1938 = vmatpush3.bf16.msra.mxu0 %v2179_v28 }
 0x2f9   :  { %1939 = vmatprep.subr.bf16.mxu0 %v2491_v35 }
 0x2fc   :  { %1940 = vmatpush3.bf16.msra.mxu0 %v2180_v29 }
 0x2fd   :  { %1941 = vmatprep.subr.bf16.mxu0 %v2491_v35 }
 0x300   :  { %1942 = vmatpush3.bf16.msra.mxu0 %v2181_v30 }
 0x301   :  { %1943 = vmatprep.subr.bf16.mxu0 %v2491_v35 }
 0x304   :  { %1944 = vmatpush3.bf16.msra.mxu0 %v2182_v31  ;;  %v207_v31 = vld [vmem:[#allocation2] sm:$0xff] }
 0x305   :  { %1945 = vmatprep.subr.bf16.mxu0 %v2491_v35 }
 0x308   :  { %1946 = vmatpush3.bf16.msra.mxu0 %v2183_v32 }
 0x309   :  { %1947 = vmatprep.subr.bf16.mxu0 %v2491_v35 }
 0x30c   :  { %1948 = vmatpush3.bf16.msra.mxu0 %v2184_v33  ;;  %v208_v33 = vld [vmem:[#allocation2 + $0x8] sm:$0xff] }
 0x3a2   :  { %v636_v52 = vpop.f32.mrb[4].mxu0 }
 0x3a3   :  { %v637_v53 = vadd.f32 %v636_v52, %v553_v51  ;;  %v1896_v54 = vpop.f32.mrb[5].mxu0  ;;  %v1188_v51 = vld [vmem:[%s3108_s20 + $0x48] sm:$0xff] }
 0x3a4   :  { %v639_v55 = vpop.f32.mrb[6].mxu0  ;;  %v2055_v52 = vpack.c.bf16 %v1188_v51, %v1187_v50  ;;  %v1190_v54 = vld [vmem:[%s3108_s20 + $0x58] sm:$0xff] }
 0x3a5   :  { %v642_v56 = vmax.f32 %v637_v53, 0.0  ;;  %v1897_v57 = vpop.f32.mrb[7].mxu0  ;;  %v1189_v53 = vld [vmem:[%s3108_s20 + $0x50] sm:$0xff] }
 0x3a6   :  { %v2058_v55 = vpack.c.bf16 %v1190_v54, %v1189_v53 }
 0x3a7   :  { %v648_v60 = vrot.slane %v642_v56, %v2879_v43 }
 0x3a9   :  { %v650_v61 = vmul.f32 %v648_v60, %v644_v58  ;;  %v649_v62 = vmul.f32 %v648_v60, %v643_v59  ;;  %v928_v59 = vld [vmem:[%s3104_s16] sm:$0x1] }
 0x3ab   :  { %1930 = vmatprep.mubr.f32.mxu1 %v649_v62 }
 0x3ac   :  { %1931 = vmatmul.mubr.f32.vlgmr.msra.gmra.mrb[4].mxu1 %v650_v61 }
 0x3ad   :  { %1819 = vmatpush3.bf16.msra.mxu1 %v2162_v63 }
 0x3ae   :  { %1820 = vmatprep.subr.bf16.mxu1 %v2163_v1 }
 0x3b1   :  { %1821 = vmatpush3.bf16.msra.mxu1 %v2164_v2 }
 0x3b2   :  { %1822 = vmatprep.subr.bf16.mxu1 %v2165_v3 }
 0x3b5   :  { %1823 = vmatpush3.bf16.msra.mxu1 %v2166_v4  ;;  %v1191_v4 = vld [vmem:[%s3108_s20 + $0x60] sm:$0xff] }
 0x3b6   :  { %1824 = vmatprep.subr.bf16.mxu1 %v2167_v5  ;;  %v1192_v5 = vld [vmem:[%s3108_s20 + $0x68] sm:$0xff] }
 0x3b9   :  { %1825 = vmatpush3.bf16.msra.mxu1 %v2168_v6  ;;  %v2061_v6 = vpack.c.bf16 %v1192_v5, %v1191_v4 }
 0x3ba   :  { %1826 = vmatprep.subr.bf16.mxu1 %v2169_v7  ;;  %v1193_v7 = vld [vmem:[%s3108_s20 + $0x70] sm:$0xff] }
 0x3bd   :  { %1827 = vmatpush3.bf16.msra.mxu1 %v2170_v8  ;;  %v1194_v8 = vld [vmem:[%s3108_s20 + $0x78] sm:$0xff] }
 0x3be   :  { %1828 = vmatprep.subr.bf16.mxu1 %v2171_v9  ;;  %v2064_v9 = vpack.c.bf16 %v1194_v8, %v1193_v7 }
 0x3c1   :  { %1829 = vmatpush3.bf16.msra.mxu1 %v2172_v11  ;;  %v1352_v11 = vsel %vm1351_vm1, %v3028_v10, 0.0 }
 0x3c2   :  { %v885_v16 = vpop.f32.mrb[8].mxu0  ;;  %1830 = vmatprep.subr.bf16.mxu1 %v2173_v12  ;;  %1353 = vadd.xlane.f32.xlu0 %v1352_v11  ;;  %v1083_v12 = vld [vmem:[%s3106_s18] sm:$0x1] }
 0x3c3   :  { %v886_v18 = vadd.f32 %v885_v16, %v844_v13  ;;  %v887_v19 = vpop.f32.mrb[9].mxu0 }
 0x3c4   :  { %v888_v20 = vadd.f32 %v887_v19, %v848_v14  ;;  %v889_v21 = vpop.f32.mrb[10].mxu0  ;;  %v1173_v19 = vld [vmem:[%s3107_s19] sm:$0xff] }
 0x3c5   :  { %v890_v22 = vpop.f32.mrb[11].mxu0  ;;  %1831 = vmatpush3.bf16.msra.mxu1 %v2174_v15  ;;  %v892_v24 = vmax.f32 %v886_v18, 0.0 }
 0x3c6   :  { %v893_v25 = vmax.f32 %v888_v20, 0.0  ;;  %1832 = vmatprep.subr.bf16.mxu1 %v2175_v17  ;;  %v209_v22 = vld [vmem:[%s3137_s6] sm:$0xff] }
 0x3c7   :  { %v894_v27 = vpack.c.bf16 %v892_v24, %v892_v24 }
 0x3c8   :  { %v895_v26 = vpack.c.bf16 %v893_v25, %v893_v25 }
 0x3c9   :  { %1833 = vmatpush3.bf16.msra.mxu1 %v2176_v23  ;;  %v210_v23 = vld [vmem:[%s3137_s6 + $0x8] sm:$0xff] }
 0x3ca   :  { %1057 = vmatprep.mubr.bf16.mxu1 %v895_v26  ;;  %2042 = vmatprep.subr.bf16.mxu1 %v2493_v0 }
 0x3cc   :  { %1058 = vmatmul.mubr.bf16.vlgmr.msra.gmra.mrb[8].mxu1 %v894_v27 }
 0x3cd   :  { %1985 = vmatprep.mubr.msk.f32.mxu1 %vm2492_vm0, %v2491_v35  ;;  %2044 = vmatpush3.bf16.msra.mxu1 %v2043_v38 }
 0x3ce   :  { %2045 = vmatprep.subr.bf16.mxu1 %v2493_v0 }
 0x3d1   :  { %2047 = vmatpush3.bf16.msra.mxu1 %v2046_v40 }
 0x3d2   :  { %2048 = vmatprep.subr.bf16.mxu1 %v2493_v0 }
 0x3d5   :  { %2050 = vmatpush3.bf16.msra.mxu1 %v2049_v46 }
 0x3d6   :  { %2051 = vmatprep.subr.bf16.mxu1 %v2493_v0 }
 0x3d9   :  { %2053 = vmatpush3.bf16.msra.mxu1 %v2052_v49 }
 0x3da   :  { %2054 = vmatprep.subr.bf16.mxu1 %v2493_v0 }
 0x3dd   :  { %2056 = vmatpush3.bf16.msra.mxu1 %v2055_v52 }
 0x3de   :  { %2057 = vmatprep.subr.bf16.mxu1 %v2493_v0 }
 0x3e1   :  { %2059 = vmatpush3.bf16.msra.mxu1 %v2058_v55 }
 0x3e2   :  { %2060 = vmatprep.subr.bf16.mxu1 %v2493_v0 }
 0x3e5   :  { %2062 = vmatpush3.bf16.msra.mxu1 %v2061_v6 }
 0x3e6   :  { %2063 = vmatprep.subr.bf16.mxu1 %v2493_v0 }
 0x3e9   :  { %2065 = vmatpush3.bf16.msra.mxu1 %v2064_v9 }
 0x3ea   :  { %1988 = vmatprep.subr.mxu1 %v3028_v10 }
 0x47f   :  { %v3008_v56 = vpop.f32.mrb[4].mxu1 }
 0x480   :  { %v3010_v57 = vpop.f32.mrb[5].mxu1 }
 0x481   :  { %v1442_v38 = vmul.f32 %v3010_v57, %v209_v22 }
 0x49f   :  { %v1834_v58 = vpop.f32.mrb[8].mxu1 }
 0x4a0   :  { %v1835_v60 = vpop.f32.mrb[9].mxu1 }
 0x4a1   :  { %v1836_v61 = vadd.f32 %v1835_v60, %v1834_v58  ;;  %v1837_v62 = vpop.f32.mrb[10].mxu1 }
 0x4a2   :  { %v1838_v63 = vpop.f32.mrb[11].mxu1 }
 0x4a3   :  { %v1060_v1 = vadd.f32 %v1836_v61, %v928_v59 }
 0x4a5   :  { %v1065_v2 = vmax.f32 %v1060_v1, 0.0 }
 0x4a7   :  { %v1066_v3 = vpack.c.bf16 %v1065_v2, %v1065_v2 }
 0x4a9   :  { %1950 = vmatmul.mubr.bf16.vlgmr.msra.gmra.mrb[12].mxu0 %v1066_v3 }
 0x57c   :  { %v1166_v13 = vpop.f32.mrb[12].mxu0 }
 0x57d   :  { %v1167_v14 = vadd.f32 %v1166_v13, %v1083_v12  ;;  %v1951_v15 = vpop.f32.mrb[13].mxu0 }
 0x57e   :  { %v1169_v16 = vpop.f32.mrb[14].mxu0 }
 0x57f   :  { %v1172_v17 = vmax.f32 %v1167_v14, 0.0  ;;  %v1952_v18 = vpop.f32.mrb[15].mxu0 }
 0x581   :  { %v1177_v20 = vrot.slane %v1172_v17, %v2879_v43  ;;  %v1354_v43 = vpop.xlane.xlu0 %1353 }
 0x582   :  { %v1355_v24 = vadd.f32 1e-06, %v1354_v43 }
 0x583   :  { %v1178_v21 = vmul.f32 %v1177_v20, %v1173_v19 }
 0x584   :  { %2185 = vrcp.f32 %v1355_v24 }
 0x585   :  { %1986 = vmatmul.mubr.f32.vlgmr.msra.gmra.mrb[6].mxu1 %v1178_v21 }
 0x586   :  { %1989 = vmatpush3.msra.mxu1 %v3028_v10  ;;  %1990 = vmatprep.mubr.msk.f32.mxu1 %vm1265_vm2, %v209_v22 }
 0x587   :  { %1998 = vmatprep.subr.mxu1 %v3028_v10 }
 0x589   :  { %1991 = vmatmul.mubr.msk.f32.vlgmr.msra.gmra.mrb[12].mxu1 %vm1265_vm2, %v210_v23 }
 0x58a   :  { %1999 = vmatpush3.msra.mxu1 %v3028_v10 }
 0x58e   :  { %v2186_v25 = vpop.eup %2185 }
 0x58f   :  { %v1357_v26 = vmul.f32 %v2186_v25, %v3028_v10 }
 0x591   :  { %1993 = vmatprep.subr.msk.mxu0 %vm1351_vm1, %v1357_v26 }
 0x592   :  { %1994 = vmatpush3.xpose.msk.msra.mxu0 %vm1351_vm1, %v1357_v26 }
 0x593   :  { %2066 = vmatprep.subr.bf16.mxu0 %v2493_v0  ;;  %v1443_v0 = vmul.f32 %v3008_v56, %v210_v23 }
 0x658   :  { %v1261_v27 = vpop.f32.mrb[6].mxu1 }
 0x659   :  { %v1987_v42 = vpop.f32.mrb[7].mxu1  ;;  %v1653_v7 = vmul.f32 %v1261_v27, %v3028_v10 }
 0x65c   :  { %v1992_v45 = vpop.f32.mrb[12].mxu1 }
 0x65d   :  { %v1344_v28 = vadd.f32 1e-06, %v1992_v45  ;;  %v1338_v29 = vpop.f32.mrb[13].mxu1 }
 0x65e   :  { %v1339_v30 = vadd.f32 1e-06, %v1338_v29 }
 0x65f   :  { %2187 = vrcp.f32 %v1344_v28 }
 0x660   :  { %2189 = vrcp.f32 %v1339_v30 }
 0x669   :  { %v2188_v32 = vpop.eup %2187 }
 0x66a   :  { %v2190_v34 = vpop.eup %2189  ;;  %v1350_v37 = vmul.f32 %v2188_v32, %v208_v33 }
 0x66b   :  { %v1349_v36 = vmul.f32 %v2190_v34, %v207_v31 }
 0x66d   :  { %1995 = vmatprep.mubr.msk.f32.mxu0 %vm1351_vm1, %v1349_v36 }
 0x66e   :  { %1996 = vmatmul.mubr.msk.f32.vlgmr.msra.gmra.mrb[16].mxu0 %vm1351_vm1, %v1350_v37 }
 0x66f   :  { %2007 = vmatprep.mubr.msk.f32.mxu0 %vm2492_vm0, %v2491_v35 }
 0x741   :  { %v1997_v39 = vpop.f32.mrb[16].mxu0 }
 0x742   :  { %v1445_v40 = vmul.f32 %v1997_v39, %v1443_v0  ;;  %v1433_v41 = vpop.f32.mrb[17].mxu0 }
 0x743   :  { %v1444_v44 = vmul.f32 %v1442_v38, %v1433_v41 }
 0x744   :  { %v1447_v46 = vmax.f32 %v1445_v40, 1e-06 }
 0x745   :  { %v1446_v47 = vmax.f32 %v1444_v44, 1e-06 }
 0x746   :  { %1449 = vst.msk [vmem:[%s3109_s21 + $0x8] sm:$0xff] %vm1265_vm2, %v1447_v46  ;;  %v1536_v48 = vsel %vm1265_vm2, %v1447_v46, 0.0 }
 0x747   :  { %1448 = vst.msk [vmem:[%s3109_s21] sm:$0xff] %vm1265_vm2, %v1446_v47  ;;  %v1535_v35 = vsel %vm1265_vm2, %v1446_v47, 0.0  ;;  %2000 = vmatprep.mubr.msk.f32.mxu1 %vm1265_vm2, %v1446_v47  ;;  %s2494_s21 = smov [#allocation20]  }
 0x748   :  { %v1537_v49 = vadd.f32 %v1536_v48, %v1535_v35  ;;  %2001 = vmatmul.mubr.msk.f32.vlgmr.msra.gmra.mrb[14].mxu1 %vm1265_vm2, %v1447_v46  ;;  %s1665_s9 = sshll.u32 %s2494_s21, 4  ;;  %s1666_s9 = int_to_ptr.vmem [resolvable:$true] %s1665_s9 }
 0x749   :  { %s2439_s23 = scalar_lea.vmem %s1666_s9, 128  ;;  %p2444_p5 = scmp.lt.s32.totalorder %s1666_s9, %s1666_s9 }
 0x74a   :  { %v1538_v50 = vrot.slane %v1537_v49, 4  ;;  %p2440_p4 = scmp.ne.s32.totalorder %s1666_s9, %s2439_s23  ;;  %p2445_p6 = scmp.lt.s32.totalorder %s2439_s23, %s2439_s23 }
 0x74c   :  { %v1539_v51 = vadd.f32 %v1538_v50, %v1537_v49  ;;  %p2446_p7 = por %p2445_p6, %p2444_p5 }
 0x74e   :  { %v1540_v52 = vrot.slane %v1539_v51, 2  ;;  %p2447_p8 = pnand %p2446_p7, %p2440_p4 }
 0x750   :  { %v1541_v53 = vadd.f32 %v1540_v52, %v1539_v51 }
 0x752   :  { %v1542_v54 = vrot.slane %v1541_v53, 1 }
 0x754   :  { %v1543_v55 = vadd.f32 %v1542_v54, %v1541_v53 }
 0x756   :  { %v1544_v56 = vadd.f32 1e-06, %v1543_v55 }
 0x758   :  { %2191 = vrcp.f32 %v1544_v56 }
 0x762   :  { %v2192_v57 = vpop.eup %2191 }
 0x763   :  { %v1546_v58 = vmul.f32 %v2192_v57, %v1446_v47  ;;  %v1547_v59 = vmul.f32 %v2192_v57, %v1447_v46 }
 0x765   :  { %1548 = vxpose.xlu0.b32.start [1/2] (short) (narrow) %v1546_v58, 8 }
 0x769   :  { %1549 = vxpose.xlu0.b32.end [2/2] (short) (narrow) %v1547_v59, 8 }
 0x7e5   :  { %v1564_v6 = vpop.trf.xlu0 }
 0x81b   :  { %v2002_v60 = vpop.f32.mrb[14].mxu1 }
 0x81c   :  { %v1528_v61 = vadd.f32 1e-06, %v2002_v60  ;;  %v1522_v62 = vpop.f32.mrb[15].mxu1 }
 0x81d   :  { %v1523_v63 = vadd.f32 1e-06, %v1522_v62 }
 0x81e   :  { %2193 = vrcp.f32 %v1528_v61 }
 0x81f   :  { %2195 = vrcp.f32 %v1523_v63 }
 0x828   :  { %v2194_v1 = vpop.eup %2193 }
 0x829   :  { %v2196_v2 = vpop.eup %2195  ;;  %v1534_v3 = vmul.f32 %v2194_v1, %v208_v33 }
 0x82a   :  { %v1533_v4 = vmul.f32 %v2196_v2, %v207_v31 }
 0x82c   :  { %v2067_v5 = vpack.c.bf16 %v1534_v3, %v1533_v4 }
 0x82e   :  { %2068 = vmatpush3.bf16.msra.mxu0 %v2067_v5 }
 0x831   :  { %2008 = vmatmul.mubr.msk.f32.vlgmr.msra.gmra.mrb[18].mxu0 %vm1351_vm1, %v1564_v6 }
 0x904   :  { %v1649_v8 = vpop.f32.mrb[18].mxu0 }
 0x905   :  { %v1654_v9 = vmul.f32 %v1653_v7, %v1649_v8  ;;  %v2009_v11 = vpop.f32.mrb[19].mxu0 }
 0x907   :  { %v1655_v12 = vmax.f32 %v1654_v9, 1e-06 }
 0x909   :  { %1656 = vst.msk [vmem:[#allocation20] sm:$0xff] %vm1351_vm1, %v1655_v12 }
 0x90a   :  { %2450 = shalt.err (!%p2447_p8)
}
 0x90b   :  { %s2451_s10 = scalar_lea.hbm %s3110_s22, 128 }
 0x90c   :  { %p2452_p9 = scmp.ne.s32.totalorder %s3110_s22, %s2451_s10  ;;  %p2455_p10 = scmp.lt.u32.totalorder %s2451_s10, %s3110_s22 }
 0x90e   :  { %p2457_p11 = pnand %p2455_p10, %p2452_p9 }
 0x910   :  { %2460 = shalt.err (!%p2457_p11)
}
 0x911   :  { %1668 = dma.vmem_to_hbm [thread:$0]  %s1666_s9, 128, %s3110_s22, [#allocation4]  }
 0x912   :  { %2473 = dma.done.wait [#allocation4], 128  }
 0x913   :  { %2474 = vsyncadd [#allocation4], 4294967168 }
 0x914   :  { %1674 = vsyncpa [#allocation3], 1 }
 0x915   :  { %1675 = vsyncpa [#allocation6], 1 }
 0x916   :  { %1676 = vsyncpa [#allocation9], 1 }
 0x917   :  { %1677 = vsyncpa [#allocation12], 1 }
 0x918   :  { %1678 = vsyncpa [#allocation15], 1 }
 0x919   :  { %1679 = vsyncpa [#allocation18], 1 }
 0x91a   :  { %1680 = vsyncpa [#allocation4], 1 }

</bundles_post_ra>
